<compile_context>
chip_gen: v7x
topology: tpu7x:2x2x1
jax: 0.10.0
libtpu: 0.0.40
codegen_flags: <defaults>
</compile_context>

<pallas_src>
import jax
import jax.numpy as jnp
import numpy as np
from jax.experimental import pallas as pl
from jax.experimental.pallas import tpu as pltpu

HIDDEN = 256


def _round_up(x, m):
    return (x + m - 1) // m * m


def _critic_kernel(s_ref, a_ref,
                   w15s_ref, w15a_ref, b15_ref,
                   w2_ref, b2_ref, w6_ref, b6_ref,
                   w37_ref, b37_ref,
                   q_ref):
    # MXU inputs in bf16, accumulation + epilogue in f32.
    s = s_ref[...].astype(jnp.bfloat16)
    a = a_ref[...].astype(jnp.bfloat16)

    # ---- fused first layer of both heads: (TB, 512) ----
    hg = (jnp.dot(s, w15s_ref[...], preferred_element_type=jnp.float32)
          + jnp.dot(a, w15a_ref[...], preferred_element_type=jnp.float32)
          + b15_ref[...])
    hg = jnp.maximum(hg, 0.0)

    # Slices land on a 128-lane boundary (256), so they are cheap.
    h = hg[:, :HIDDEN].astype(jnp.bfloat16)   # Q1 branch
    g = hg[:, HIDDEN:].astype(jnp.bfloat16)   # Q2 branch

    # ---- second layers (keep the full 256x256 shape: matches the MXU) ----
    h2 = jnp.maximum(
        jnp.dot(h, w2_ref[...], preferred_element_type=jnp.float32) + b2_ref[...], 0.0)
    g2 = jnp.maximum(
        jnp.dot(g, w6_ref[...], preferred_element_type=jnp.float32) + b6_ref[...], 0.0)

    # ---- fused output layer: block-diagonal (512, 2) -> single (TB, 2) store ----
    hg2 = jnp.concatenate([h2, g2], axis=1).astype(jnp.bfloat16)  # (TB, 512)
    q = jnp.dot(hg2, w37_ref[...], preferred_element_type=jnp.float32) + b37_ref[...]
    q_ref[...] = q.astype(q_ref.dtype)


def critic_forward(state, action, params, *, batch_tile=1024):
    """Returns (q1, q2), each of shape (batch, 1), float32."""
    B, state_dim = state.shape
    action_dim = action.shape[1]

    # Batch tile: multiple of 8 sublanes, capped so the per-step footprint stays
    # comfortably inside scoped VMEM even on v7x (64 MiB physical).
    TB = min(batch_tile, _round_up(B, 8))
    Bp = _round_up(B, TB)
    if Bp != B:
        pad = ((0, Bp - B), (0, 0))
        state = jnp.pad(state, pad)
        action = jnp.pad(action, pad)

    grid = (Bp // TB,)

    in_specs = [
        # activations: tiled over batch
        pl.BlockSpec((TB, state_dim), lambda i: (i, 0)),
        pl.BlockSpec((TB, action_dim), lambda i: (i, 0)),
        # weights/biases: constant index_map -> stay resident in VMEM across steps
        pl.BlockSpec((state_dim, 2 * HIDDEN), lambda i: (0, 0)),
        pl.BlockSpec((action_dim, 2 * HIDDEN), lambda i: (0, 0)),
        pl.BlockSpec((1, 2 * HIDDEN), lambda i: (0, 0)),
        pl.BlockSpec((HIDDEN, HIDDEN), lambda i: (0, 0)),
        pl.BlockSpec((1, HIDDEN), lambda i: (0, 0)),
        pl.BlockSpec((HIDDEN, HIDDEN), lambda i: (0, 0)),
        pl.BlockSpec((1, HIDDEN), lambda i: (0, 0)),
        pl.BlockSpec((2 * HIDDEN, 2), lambda i: (0, 0)),
        pl.BlockSpec((1, 2), lambda i: (0, 0)),
    ]
    out_specs = pl.BlockSpec((TB, 2), lambda i: (i, 0))

    q = pl.pallas_call(
        _critic_kernel,
        out_shape=jax.ShapeDtypeStruct((Bp, 2), jnp.float32),
        grid=grid,
        in_specs=in_specs,
        out_specs=out_specs,
        compiler_params=pltpu.CompilerParams(
            dimension_semantics=("parallel",)),
    )(state, action,
      params["w15_s"], params["w15_a"], params["b15"],
      params["w2"], params["b2"], params["w6"], params["b6"],
      params["w37"], params["b37"])

    q = q[:B]
    return q[:, 0:1], q[:, 1:2]


def init_params(key, state_dim, action_dim, weight_dtype=jnp.bfloat16):
    """Mirrors nn.Linear defaults (U(-1/sqrt(fan_in), +)), then packs/fuses:
         w15_s/w15_a: layer-1 weights of both heads, split by state/action rows
         w37: block-diagonal (512, 2) holding l3 and l7 columns
       Weights are stored (in, out) == PyTorch weight.T; biases kept 2D, f32.
    """
    in_dim = state_dim + action_dim

    def linear(k, fan_in, fan_out):
        kw, kb = jax.random.split(k)
        bound = 1.0 / np.sqrt(fan_in)
        w = jax.random.uniform(kw, (fan_in, fan_out), jnp.float32, -bound, bound)
        b = jax.random.uniform(kb, (1, fan_out), jnp.float32, -bound, bound)
        return w, b

    keys = jax.random.split(key, 6)
    w1, b1 = linear(keys[0], in_dim, HIDDEN)
    w2, b2 = linear(keys[1], HIDDEN, HIDDEN)
    w3, b3 = linear(keys[2], HIDDEN, 1)
    w5, b5 = linear(keys[3], in_dim, HIDDEN)
    w6, b6 = linear(keys[4], HIDDEN, HIDDEN)
    w7, b7 = linear(keys[5], HIDDEN, 1)

    w15 = jnp.concatenate([w1, w5], axis=1)     # (in_dim, 512)
    b15 = jnp.concatenate([b1, b5], axis=1)     # (1, 512)

    w37 = jnp.zeros((2 * HIDDEN, 2), jnp.float32)
    w37 = w37.at[:HIDDEN, 0:1].set(w3).at[HIDDEN:, 1:2].set(w7)
    b37 = jnp.concatenate([b3, b7], axis=1)     # (1, 2)

    wd = weight_dtype
    return dict(
        w15_s=w15[:state_dim].astype(wd),
        w15_a=w15[state_dim:].astype(wd),
        b15=b15,
        w2=w2.astype(wd), b2=b2,
        w6=w6.astype(wd), b6=b6,
        w37=w37.astype(wd), b37=b37,
    )


def critic_forward_ref(state, action, params):
    """Pure-JAX reference mirroring the kernel math (bf16 matmuls, f32 accum)."""
    f32 = jnp.float32
    s = state.astype(jnp.bfloat16)
    a = action.astype(jnp.bfloat16)
    hg = (jnp.dot(s, params["w15_s"], preferred_element_type=f32)
          + jnp.dot(a, params["w15_a"], preferred_element_type=f32)
          + params["b15"])
    hg = jnp.maximum(hg, 0.0)
    h = hg[:, :HIDDEN].astype(jnp.bfloat16)
    g = hg[:, HIDDEN:].astype(jnp.bfloat16)
    h2 = jnp.maximum(jnp.dot(h, params["w2"], preferred_element_type=f32) + params["b2"], 0.0)
    g2 = jnp.maximum(jnp.dot(g, params["w6"], preferred_element_type=f32) + params["b6"], 0.0)
    hg2 = jnp.concatenate([h2, g2], axis=1).astype(jnp.bfloat16)
    q = jnp.dot(hg2, params["w37"], preferred_element_type=f32) + params["b37"]
    return q[:, 0:1], q[:, 1:2]


if __name__ == "__main__":
    key = jax.random.PRNGKey(0)
    k_params, k_state, k_action = jax.random.split(key, 3)

    batch, state_dim, action_dim = 2, 16, 8
    params = init_params(k_params, state_dim, action_dim)
    state = jax.random.normal(k_state, (batch, state_dim), jnp.float32)
    action = jax.random.normal(k_action, (batch, action_dim), jnp.float32)

    q1, q2 = jax.jit(critic_forward)(state, action, params)
    jax.block_until_ready((q1, q2))

    q1_ref, q2_ref = critic_forward_ref(state, action, params)
    assert q1.shape == (batch, 1) and q2.shape == (batch, 1)
    assert jnp.allclose(q1, q1_ref, atol=1e-3, rtol=1e-3)
    assert jnp.allclose(q2, q2_ref, atol=1e-3, rtol=1e-3)

    print("KERNEL_OK")
</pallas_src>

<mosaic_0001>
module attributes {stable_mosaic.version = 11 : i64} {
  func.func @_critic_kernel(%arg0: i32, %arg1: memref<8x16xf32, #tpu.memory_space<vmem>>, %arg2: memref<8x8xf32, #tpu.memory_space<vmem>>, %arg3: memref<16x512xbf16, #tpu.memory_space<vmem>>, %arg4: memref<8x512xbf16, #tpu.memory_space<vmem>>, %arg5: memref<1x512xf32, #tpu.memory_space<vmem>>, %arg6: memref<256x256xbf16, #tpu.memory_space<vmem>>, %arg7: memref<1x256xf32, #tpu.memory_space<vmem>>, %arg8: memref<256x256xbf16, #tpu.memory_space<vmem>>, %arg9: memref<1x256xf32, #tpu.memory_space<vmem>>, %arg10: memref<512x2xbf16, #tpu.memory_space<vmem>>, %arg11: memref<1x2xf32, #tpu.memory_space<vmem>>, %arg12: memref<8x2xf32, #tpu.memory_space<vmem>>) attributes {dimension_semantics = [#tpu.dimension_semantics<parallel>], iteration_bounds = array<i64: 1>, scalar_prefetch = 0 : i64, scratch_operands = 0 : i64, tpu.core_type = #tpu.core_type<tc>, window_params = [{transform_indices = @transform_0, window_bounds = array<i64: 8, 16>}, {transform_indices = @transform_1, window_bounds = array<i64: 8, 8>}, {pipeline_mode = #tpu.pipeline_mode<synchronous>, transform_indices = @transform_2, window_bounds = array<i64: 16, 512>}, {pipeline_mode = #tpu.pipeline_mode<synchronous>, transform_indices = @transform_3, window_bounds = array<i64: 8, 512>}, {pipeline_mode = #tpu.pipeline_mode<synchronous>, transform_indices = @transform_4, window_bounds = array<i64: 1, 512>}, {pipeline_mode = #tpu.pipeline_mode<synchronous>, transform_indices = @transform_5, window_bounds = array<i64: 256, 256>}, {pipeline_mode = #tpu.pipeline_mode<synchronous>, transform_indices = @transform_6, window_bounds = array<i64: 1, 256>}, {pipeline_mode = #tpu.pipeline_mode<synchronous>, transform_indices = @transform_7, window_bounds = array<i64: 256, 256>}, {pipeline_mode = #tpu.pipeline_mode<synchronous>, transform_indices = @transform_8, window_bounds = array<i64: 1, 256>}, {pipeline_mode = #tpu.pipeline_mode<synchronous>, transform_indices = @transform_9, window_bounds = array<i64: 512, 2>}, {pipeline_mode = #tpu.pipeline_mode<synchronous>, transform_indices = @transform_10, window_bounds = array<i64: 1, 2>}, {transform_indices = @transform_11, window_bounds = array<i64: 8, 2>}]} {
    %c0 = arith.constant 0 : index
    %c0_0 = arith.constant 0 : index
    %0 = vector.load %arg1[%c0, %c0_0] : memref<8x16xf32, #tpu.memory_space<vmem>>, vector<8x16xf32>
    %1 = arith.truncf %0 : vector<8x16xf32> to vector<8x16xbf16>
    %c0_1 = arith.constant 0 : index
    %c0_2 = arith.constant 0 : index
    %2 = vector.load %arg2[%c0_1, %c0_2] : memref<8x8xf32, #tpu.memory_space<vmem>>, vector<8x8xf32>
    %3 = arith.truncf %2 : vector<8x8xf32> to vector<8x8xbf16>
    %c0_3 = arith.constant 0 : index
    %c0_4 = arith.constant 0 : index
    %4 = vector.load %arg3[%c0_3, %c0_4] : memref<16x512xbf16, #tpu.memory_space<vmem>>, vector<16x512xbf16>
    %cst = arith.constant dense<0.000000e+00> : vector<8x512xf32>
    %5 = tpu.matmul %1, %4, %cst {dimension_numbers = #tpu.dot_dimension_numbers<[1], [0], [0], [1], [0, 0, 1, 1], [], []>} : vector<8x16xbf16>, vector<16x512xbf16>, vector<8x512xf32> -> vector<8x512xf32>
    %c0_5 = arith.constant 0 : index
    %c0_6 = arith.constant 0 : index
    %6 = vector.load %arg4[%c0_5, %c0_6] : memref<8x512xbf16, #tpu.memory_space<vmem>>, vector<8x512xbf16>
    %cst_7 = arith.constant dense<0.000000e+00> : vector<8x512xf32>
    %7 = tpu.matmul %3, %6, %cst_7 {dimension_numbers = #tpu.dot_dimension_numbers<[1], [0], [0], [1], [0, 0, 1, 1], [], []>} : vector<8x8xbf16>, vector<8x512xbf16>, vector<8x512xf32> -> vector<8x512xf32>
    %8 = arith.addf %5, %7 : vector<8x512xf32>
    %c0_8 = arith.constant 0 : index
    %c0_9 = arith.constant 0 : index
    %9 = vector.load %arg5[%c0_8, %c0_9] : memref<1x512xf32, #tpu.memory_space<vmem>>, vector<1x512xf32>
    %10 = vector.broadcast %9 : vector<1x512xf32> to vector<8x512xf32>
    %11 = arith.addf %8, %10 : vector<8x512xf32>
    %cst_10 = arith.constant 0.000000e+00 : f32
    %12 = vector.broadcast %cst_10 : f32 to vector<8x512xf32>
    %13 = arith.maximumf %11, %12 : vector<8x512xf32>
    %14 = vector.extract_strided_slice %13 {offsets = [0, 0], sizes = [8, 256], strides = [1, 1]} : vector<8x512xf32> to vector<8x256xf32>
    %15 = arith.truncf %14 : vector<8x256xf32> to vector<8x256xbf16>
    %16 = vector.extract_strided_slice %13 {offsets = [0, 256], sizes = [8, 256], strides = [1, 1]} : vector<8x512xf32> to vector<8x256xf32>
    %17 = arith.truncf %16 : vector<8x256xf32> to vector<8x256xbf16>
    %c0_11 = arith.constant 0 : index
    %c0_12 = arith.constant 0 : index
    %18 = vector.load %arg6[%c0_11, %c0_12] : memref<256x256xbf16, #tpu.memory_space<vmem>>, vector<256x256xbf16>
    %cst_13 = arith.constant dense<0.000000e+00> : vector<8x256xf32>
    %19 = tpu.matmul %15, %18, %cst_13 {dimension_numbers = #tpu.dot_dimension_numbers<[1], [0], [0], [1], [0, 0, 1, 1], [], []>} : vector<8x256xbf16>, vector<256x256xbf16>, vector<8x256xf32> -> vector<8x256xf32>
    %c0_14 = arith.constant 0 : index
    %c0_15 = arith.constant 0 : index
    %20 = vector.load %arg7[%c0_14, %c0_15] : memref<1x256xf32, #tpu.memory_space<vmem>>, vector<1x256xf32>
    %21 = vector.broadcast %20 : vector<1x256xf32> to vector<8x256xf32>
    %22 = arith.addf %19, %21 : vector<8x256xf32>
    %cst_16 = arith.constant 0.000000e+00 : f32
    %23 = vector.broadcast %cst_16 : f32 to vector<8x256xf32>
    %24 = arith.maximumf %22, %23 : vector<8x256xf32>
    %c0_17 = arith.constant 0 : index
    %c0_18 = arith.constant 0 : index
    %25 = vector.load %arg8[%c0_17, %c0_18] : memref<256x256xbf16, #tpu.memory_space<vmem>>, vector<256x256xbf16>
    %cst_19 = arith.constant dense<0.000000e+00> : vector<8x256xf32>
    %26 = tpu.matmul %17, %25, %cst_19 {dimension_numbers = #tpu.dot_dimension_numbers<[1], [0], [0], [1], [0, 0, 1, 1], [], []>} : vector<8x256xbf16>, vector<256x256xbf16>, vector<8x256xf32> -> vector<8x256xf32>
    %c0_20 = arith.constant 0 : index
    %c0_21 = arith.constant 0 : index
    %27 = vector.load %arg9[%c0_20, %c0_21] : memref<1x256xf32, #tpu.memory_space<vmem>>, vector<1x256xf32>
    %28 = vector.broadcast %27 : vector<1x256xf32> to vector<8x256xf32>
    %29 = arith.addf %26, %28 : vector<8x256xf32>
    %cst_22 = arith.constant 0.000000e+00 : f32
    %30 = vector.broadcast %cst_22 : f32 to vector<8x256xf32>
    %31 = arith.maximumf %29, %30 : vector<8x256xf32>
    %32 = tpu.concatenate %24, %31 in 1 : vector<8x256xf32>, vector<8x256xf32> -> vector<8x512xf32>
    %33 = arith.truncf %32 : vector<8x512xf32> to vector<8x512xbf16>
    %c0_23 = arith.constant 0 : index
    %c0_24 = arith.constant 0 : index
    %34 = vector.load %arg10[%c0_23, %c0_24] : memref<512x2xbf16, #tpu.memory_space<vmem>>, vector<512x2xbf16>
    %cst_25 = arith.constant dense<0.000000e+00> : vector<8x2xf32>
    %35 = tpu.matmul %33, %34, %cst_25 {dimension_numbers = #tpu.dot_dimension_numbers<[1], [0], [0], [1], [0, 0, 1, 1], [], []>} : vector<8x512xbf16>, vector<512x2xbf16>, vector<8x2xf32> -> vector<8x2xf32>
    %c0_26 = arith.constant 0 : index
    %c0_27 = arith.constant 0 : index
    %36 = vector.load %arg11[%c0_26, %c0_27] : memref<1x2xf32, #tpu.memory_space<vmem>>, vector<1x2xf32>
    %37 = vector.broadcast %36 : vector<1x2xf32> to vector<8x2xf32>
    %38 = arith.addf %35, %37 : vector<8x2xf32>
    %c0_28 = arith.constant 0 : index
    %c0_29 = arith.constant 0 : index
    %39 = vector.load %arg12[%c0_28, %c0_29] : memref<8x2xf32, #tpu.memory_space<vmem>>, vector<8x2xf32>
    tpu.vector_store %arg12[%c0_28, %c0_29], %38 {strides = array<i32>} : memref<8x2xf32, #tpu.memory_space<vmem>>, vector<8x2xf32>,
    return
  }
  func.func @transform_0(%arg0: i32) -> (i32, i32) {
    %c0_i32 = arith.constant 0 : i32
    %c0_i32_0 = arith.constant 0 : i32
    return %arg0, %c0_i32 : i32, i32
  }
  func.func @transform_1(%arg0: i32) -> (i32, i32) {
    %c0_i32 = arith.constant 0 : i32
    %c0_i32_0 = arith.constant 0 : i32
    return %arg0, %c0_i32 : i32, i32
  }
  func.func @transform_2(%arg0: i32) -> (i32, i32) {
    %c0_i32 = arith.constant 0 : i32
    %c0_i32_0 = arith.constant 0 : i32
    %c0_i32_1 = arith.constant 0 : i32
    return %c0_i32, %c0_i32_0 : i32, i32
  }
  func.func @transform_3(%arg0: i32) -> (i32, i32) {
    %c0_i32 = arith.constant 0 : i32
    %c0_i32_0 = arith.constant 0 : i32
    %c0_i32_1 = arith.constant 0 : i32
    return %c0_i32, %c0_i32_0 : i32, i32
  }
  func.func @transform_4(%arg0: i32) -> (i32, i32) {
    %c0_i32 = arith.constant 0 : i32
    %c0_i32_0 = arith.constant 0 : i32
    %c0_i32_1 = arith.constant 0 : i32
    return %c0_i32, %c0_i32_0 : i32, i32
  }
  func.func @transform_5(%arg0: i32) -> (i32, i32) {
    %c0_i32 = arith.constant 0 : i32
    %c0_i32_0 = arith.constant 0 : i32
    %c0_i32_1 = arith.constant 0 : i32
    return %c0_i32, %c0_i32_0 : i32, i32
  }
  func.func @transform_6(%arg0: i32) -> (i32, i32) {
    %c0_i32 = arith.constant 0 : i32
    %c0_i32_0 = arith.constant 0 : i32
    %c0_i32_1 = arith.constant 0 : i32
    return %c0_i32, %c0_i32_0 : i32, i32
  }
  func.func @transform_7(%arg0: i32) -> (i32, i32) {
    %c0_i32 = arith.constant 0 : i32
    %c0_i32_0 = arith.constant 0 : i32
    %c0_i32_1 = arith.constant 0 : i32
    return %c0_i32, %c0_i32_0 : i32, i32
  }
  func.func @transform_8(%arg0: i32) -> (i32, i32) {
    %c0_i32 = arith.constant 0 : i32
    %c0_i32_0 = arith.constant 0 : i32
    %c0_i32_1 = arith.constant 0 : i32
    return %c0_i32, %c0_i32_0 : i32, i32
  }
  func.func @transform_9(%arg0: i32) -> (i32, i32) {
    %c0_i32 = arith.constant 0 : i32
    %c0_i32_0 = arith.constant 0 : i32
    %c0_i32_1 = arith.constant 0 : i32
    return %c0_i32, %c0_i32_0 : i32, i32
  }
  func.func @transform_10(%arg0: i32) -> (i32, i32) {
    %c0_i32 = arith.constant 0 : i32
    %c0_i32_0 = arith.constant 0 : i32
    %c0_i32_1 = arith.constant 0 : i32
    return %c0_i32, %c0_i32_0 : i32, i32
  }
  func.func @transform_11(%arg0: i32) -> (i32, i32) {
    %c0_i32 = arith.constant 0 : i32
    %c0_i32_0 = arith.constant 0 : i32
    return %arg0, %c0_i32 : i32, i32
  }
}

</mosaic_0001>

<bundles_post_ra>
// kernel: critic_forward.1
= control target key start
LH: loop header
LB: loop body
LE: loop exit
PB: predicated region body
PF: predicated region fallthrough
CT: control target
= control target key end

     0   :  { %16 = vsyncpa [#allocation3], 0  ;;  %s1846_s0 = inlined_call_operand.vmem [shape: f32[8,16], index: 0, kind: input, shape index: {}]   ;;  %s1847_s1 = inlined_call_operand.vmem [shape: f32[8,8], index: 1, kind: input, shape index: {}]   ;;  %s1848_s2 = inlined_call_operand.vmem [shape: bf16[16,512], index: 2, kind: input, shape index: {}]   ;;  %s1849_s3 = inlined_call_operand.vmem [shape: bf16[8,512], index: 3, kind: input, shape index: {}]   ;;  %s1850_s4 = inlined_call_operand.vmem [shape: f32[1,512], index: 4, kind: input, shape index: {}]   ;;  %s1851_s5 = inlined_call_operand.vmem [shape: bf16[256,256], index: 5, kind: input, shape index: {}]   ;;  %s1852_s6 = inlined_call_operand.vmem [shape: f32[1,256], index: 6, kind: input, shape index: {}]   ;;  %s1853_s7 = inlined_call_operand.hbm [shape: bf16[256,256], index: 7, kind: input, shape index: {}]   ;;  %s1854_s8 = inlined_call_operand.vmem [shape: f32[1,256], index: 8, kind: input, shape index: {}]   ;;  %s1855_s9 = inlined_call_operand.vmem [shape: bf16[512,2], index: 9, kind: input, shape index: {}]   ;;  %s1856_s10 = inlined_call_operand.hbm [shape: f32[1,2], index: 10, kind: input, shape index: {}]   ;;  %s1857_s11 = inlined_call_operand.vmem [shape: f32[8,2], index: 11, kind: output, shape index: {}]  }
   0x1   :  { %17 = vsyncpa [#allocation5], 0  ;;  %s1519_s17 = smov [#allocation2]   ;;  %s1471_s21 = scalar_lea.hbm %s1853_s7, 4096 }
   0x2   :  { %s37_s18 = sshll.u32 %s1519_s17, 4  ;;  %p1472_p0 = scmp.ne.s32.totalorder %s1853_s7, %s1471_s21  ;;  %s38_s18 = int_to_ptr.vmem [resolvable:$true] %s37_s18 }
   0x3   :  { %p1475_p1 = scmp.lt.u32.totalorder %s1471_s21, %s1853_s7 }
   0x5   :  { %p1477_p2 = pnand %p1475_p1, %p1472_p0 }
   0x7   :  { %1480 = shalt.err (!%p1477_p2)
}
   0x8   :  { %s1481_s26 = scalar_lea.vmem %s38_s18, 4096  ;;  %p1486_p4 = scmp.lt.s32.totalorder %s38_s18, %s38_s18 }
   0x9   :  { %p1482_p3 = scmp.ne.s32.totalorder %s38_s18, %s1481_s26  ;;  %p1487_p5 = scmp.lt.s32.totalorder %s1481_s26, %s1481_s26 }
   0xb   :  { %p1488_p6 = por %p1487_p5, %p1486_p4 }
   0xd   :  { %p1489_p7 = pnand %p1488_p6, %p1482_p3 }
   0xf   :  { %1492 = shalt.err (!%p1489_p7)
}
  0x10   :  { %s1520_s27 = smov 128   ;;  %s1521_s28 = smov 8  }
  0x11   :  { %43 = dma.hbm_to_vmem [thread:$0]  %s1853_s7, 4096, %s38_s18, [#allocation3], %s1520_s27, %s1520_s27, %s1521_s28  }
  0x12   :  { %s1522_s12 = smov [#allocation4]   ;;  %s1493_s16 = scalar_lea.hbm %s1856_s10, 16 }
  0x13   :  { %s54_s13 = sshll.u32 %s1522_s12, 4  ;;  %p1494_p8 = scmp.ne.s32.totalorder %s1856_s10, %s1493_s16  ;;  %s55_s13 = int_to_ptr.vmem [resolvable:$true] %s54_s13 }
  0x14   :  { %p1497_p9 = scmp.lt.u32.totalorder %s1493_s16, %s1856_s10 }
  0x16   :  { %p1499_p10 = pnand %p1497_p9, %p1494_p8 }
  0x18   :  { %1502 = shalt.err (!%p1499_p10)
}
  0x19   :  { %s1503_s22 = scalar_lea.vmem %s55_s13, 16  ;;  %s1507_s7 = scalar_lea.vmem %s55_s13, 32 }
  0x1a   :  { %p1504_p11 = scmp.ne.s32.totalorder %s55_s13, %s1503_s22  ;;  %p1508_p12 = scmp.lt.s32.totalorder %s55_s13, %s55_s13 }
  0x1b   :  { %p1509_p13 = scmp.lt.s32.totalorder %s1507_s7, %s1503_s22 }
  0x1d   :  { %p1510_p0 = por %p1509_p13, %p1508_p12 }
  0x1f   :  { %p1511_p1 = pnand %p1510_p0, %p1504_p11 }
  0x21   :  { %1514 = shalt.err (!%p1511_p1)
}
  0x22   :  { %57 = dma.hbm_to_vmem [thread:$0]  %s1856_s10, 16, %s55_s13, [#allocation5]  }
  0x23   :  { %1515 = dma.done.wait [#allocation3], 4096  }
  0x24   :  { %1516 = vsyncadd [#allocation3], 4294963200 }
  0x25   :  { %1517 = dma.done.wait [#allocation5], 16  }
  0x26   :  { %1518 = vsyncadd [#allocation5], 4294967280  ;;  %v1523_v0 = vmov 0   ;;  %v73_v1 = vld [vmem:[%s1849_s3] sm:$0xff]  ;;  %vm89_vm0 = vcmask 1043456   ;;  %v74_v2 = vld [vmem:[%s1849_s3 + $0x8] sm:$0xff] }
  0x27   :  { %134 = vmatprep.mubr.bf16.mxu0 %v1523_v0  ;;  %175 = vmatprep.mubr.bf16.mxu1 %v1523_v0  ;;  %v67_v3 = vld [vmem:[%s1847_s1] sm:$0xff]  ;;  %v1174_v4 = vcombine.high %v73_v1, %v73_v1  ;;  %v1176_v5 = vcombine.high %v74_v2, %v74_v2  ;;  %v1173_v6 = vcombine.low %v73_v1, %v73_v1  ;;  %v1342_v13 = vld [vmem:[%s1848_s2 + $0xc] ss:$16 sps:$4 sm:$0xff]   ;;  %vm85_vm1 = vcmask 64512   ;;  %v1340_v14 = vld [vmem:[%s1848_s2 + $0x8] ss:$16 sps:$4 sm:$0xff]  }
  0x28   :  { %v1175_v7 = vcombine.low %v74_v2, %v74_v2  ;;  %v1339_v8 = vld [vmem:[%s1848_s2 + $0x4] ss:$16 sps:$4 sm:$0xff]   ;;  %v68_v11 = vpack.c.bf16 %v67_v3, %v67_v3  ;;  %v1337_v12 = vld [vmem:[%s1848_s2] ss:$16 sps:$4 sm:$0xff]   ;;  %vm204_vm2 = vcmask 130048   ;;  %vm1165_vm3 = vcmask 15360  }
  0x29   :  { %1177 = vmatprep.subr.msk.bf16.mxu0 %vm89_vm0, %v1174_v4  ;;  %1179 = vmatprep.subr.msk.bf16.mxu1 %vm89_vm0, %v1176_v5  ;;  %v91_v9 = vsel %vm89_vm0, %v1173_v6, 0  ;;  %v1345_v15 = vld [vmem:[%s1851_s5 + $0x4] ss:$8 sps:$4 sm:$0xff]   ;;  %v1343_v19 = vld [vmem:[%s1851_s5] ss:$8 sps:$4 sm:$0xff]  }
  0x2a   :  { %v97_v10 = vsel %vm89_vm0, %v1175_v7, 0  ;;  %103 = vmatpush1.bf16.msra.mxu0 %v91_v9  ;;  %v1348_v16 = vld [vmem:[#allocation2 + $0x4] ss:$8 sps:$4 sm:$0xff]   ;;  %v65_v17 = vld [vmem:[%s1846_s0] sm:$0xff]  ;;  %v1346_v20 = vld [vmem:[#allocation2] ss:$8 sps:$4 sm:$0xff]  }
  0x2b   :  { %144 = vmatpush1.bf16.msra.mxu1 %v97_v10  ;;  %208 = vmatprep.subr.bf16.mxu0 %v1339_v8  ;;  %v66_v18 = vpack.c.bf16 %v65_v17, %v65_v17  ;;  %v1351_v21 = vld [vmem:[%s1851_s5 + $0x14] ss:$8 sps:$4 sm:$0xff]   ;;  %v1349_v23 = vld [vmem:[%s1851_s5 + $0x10] ss:$8 sps:$4 sm:$0xff]   ;;  %v1357_v25 = vld [vmem:[%s1851_s5 + $0x24] ss:$8 sps:$4 sm:$0xff]  }
  0x2c   :  { %249 = vmatprep.subr.bf16.mxu1 %v1342_v13  ;;  %v1354_v22 = vld [vmem:[#allocation2 + $0x14] ss:$8 sps:$4 sm:$0xff]   ;;  %v1352_v24 = vld [vmem:[#allocation2 + $0x10] ss:$8 sps:$4 sm:$0xff]   ;;  %v1360_v26 = vld [vmem:[#allocation2 + $0x24] ss:$8 sps:$4 sm:$0xff]  }
  0x2d   :  { %1178 = vmatmul.mubr.msk.bf16.vlgmr.msra.gmra.mrb[0].mxu0 %vm85_vm1, %v68_v11  ;;  %v1355_v27 = vld [vmem:[%s1851_s5 + $0x20] ss:$8 sps:$4 sm:$0xff]   ;;  %v1363_v29 = vld [vmem:[%s1851_s5 + $0x34] ss:$8 sps:$4 sm:$0xff]   ;;  %v1361_v31 = vld [vmem:[%s1851_s5 + $0x30] ss:$8 sps:$4 sm:$0xff]  }
  0x2e   :  { %1180 = vmatmul.mubr.msk.bf16.vlgmr.msra.gmra.mrb[0].mxu1 %vm85_vm1, %v68_v11  ;;  %209 = vmatpush1.bf16.msra.mxu0 %v1337_v12  ;;  %v1358_v28 = vld [vmem:[#allocation2 + $0x20] ss:$8 sps:$4 sm:$0xff]   ;;  %v1366_v30 = vld [vmem:[#allocation2 + $0x34] ss:$8 sps:$4 sm:$0xff]   ;;  %v1364_v32 = vld [vmem:[#allocation2 + $0x30] ss:$8 sps:$4 sm:$0xff]  }
  0x2f   :  { %250 = vmatpush1.bf16.msra.mxu1 %v1340_v14  ;;  %240 = vmatprep.mubr.bf16.mxu0 %v1523_v0  ;;  %v1369_v33 = vld [vmem:[%s1851_s5 + $0x44] ss:$8 sps:$4 sm:$0xff]   ;;  %v1367_v35 = vld [vmem:[%s1851_s5 + $0x40] ss:$8 sps:$4 sm:$0xff]   ;;  %v1375_v37 = vld [vmem:[%s1851_s5 + $0x54] ss:$8 sps:$4 sm:$0xff]  }
  0x30   :  { %281 = vmatprep.mubr.bf16.mxu1 %v1523_v0  ;;  %528 = vmatprep.subr.bf16.mxu0 %v1345_v15  ;;  %v1372_v34 = vld [vmem:[#allocation2 + $0x44] ss:$8 sps:$4 sm:$0xff]   ;;  %v1370_v36 = vld [vmem:[#allocation2 + $0x40] ss:$8 sps:$4 sm:$0xff]   ;;  %v1378_v38 = vld [vmem:[#allocation2 + $0x54] ss:$8 sps:$4 sm:$0xff]  }
  0x31   :  { %775 = vmatprep.subr.bf16.mxu1 %v1348_v16  ;;  %v1373_v39 = vld [vmem:[%s1851_s5 + $0x50] ss:$8 sps:$4 sm:$0xff]   ;;  %v1381_v41 = vld [vmem:[%s1851_s5 + $0x64] ss:$8 sps:$4 sm:$0xff]   ;;  %v1379_v43 = vld [vmem:[%s1851_s5 + $0x60] ss:$8 sps:$4 sm:$0xff]  }
  0x32   :  { %v1376_v40 = vld [vmem:[#allocation2 + $0x50] ss:$8 sps:$4 sm:$0xff]   ;;  %v1384_v42 = vld [vmem:[#allocation2 + $0x64] ss:$8 sps:$4 sm:$0xff]   ;;  %v1382_v44 = vld [vmem:[#allocation2 + $0x60] ss:$8 sps:$4 sm:$0xff]  }
  0x33   :  { %v1387_v45 = vld [vmem:[%s1851_s5 + $0x74] ss:$8 sps:$4 sm:$0xff]   ;;  %v1385_v47 = vld [vmem:[%s1851_s5 + $0x70] ss:$8 sps:$4 sm:$0xff]   ;;  %v1393_v49 = vld [vmem:[%s1851_s5 + $0x84] ss:$8 sps:$4 sm:$0xff]  }
  0x34   :  { %v1390_v46 = vld [vmem:[#allocation2 + $0x74] ss:$8 sps:$4 sm:$0xff]   ;;  %v1388_v48 = vld [vmem:[#allocation2 + $0x70] ss:$8 sps:$4 sm:$0xff]   ;;  %v1396_v50 = vld [vmem:[#allocation2 + $0x84] ss:$8 sps:$4 sm:$0xff]  }
  0x35   :  { %1185 = vmatmul.mubr.msk.bf16.vlgmr.msra.gmra.mrb[4].mxu0 %vm204_vm2, %v66_v18  ;;  %v1391_v51 = vld [vmem:[%s1851_s5 + $0x80] ss:$8 sps:$4 sm:$0xff]   ;;  %v1399_v53 = vld [vmem:[%s1851_s5 + $0x94] ss:$8 sps:$4 sm:$0xff]   ;;  %v1397_v55 = vld [vmem:[%s1851_s5 + $0x90] ss:$8 sps:$4 sm:$0xff]  }
  0x36   :  { %1186 = vmatmul.mubr.msk.bf16.vlgmr.msra.gmra.mrb[4].mxu1 %vm204_vm2, %v66_v18  ;;  %529 = vmatpush1.bf16.msra.mxu0 %v1343_v19  ;;  %v1394_v52 = vld [vmem:[#allocation2 + $0x80] ss:$8 sps:$4 sm:$0xff]   ;;  %v1402_v54 = vld [vmem:[#allocation2 + $0x94] ss:$8 sps:$4 sm:$0xff]   ;;  %v1400_v56 = vld [vmem:[#allocation2 + $0x90] ss:$8 sps:$4 sm:$0xff]   ;;  %v292_v19 = vlaneseq }
  0x37   :  { %776 = vmatpush1.bf16.msra.mxu1 %v1346_v20  ;;  %530 = vmatprep.subr.bf16.mxu0 %v1351_v21  ;;  %v1405_v57 = vld [vmem:[%s1851_s5 + $0xa4] ss:$8 sps:$4 sm:$0xff]   ;;  %v1403_v59 = vld [vmem:[%s1851_s5 + $0xa0] ss:$8 sps:$4 sm:$0xff]   ;;  %v1411_v61 = vld [vmem:[%s1851_s5 + $0xb4] ss:$8 sps:$4 sm:$0xff]  }
  0x38   :  { %777 = vmatprep.subr.bf16.mxu1 %v1354_v22  ;;  %v1408_v58 = vld [vmem:[#allocation2 + $0xa4] ss:$8 sps:$4 sm:$0xff]   ;;  %v1406_v60 = vld [vmem:[#allocation2 + $0xa0] ss:$8 sps:$4 sm:$0xff]   ;;  %v1414_v62 = vld [vmem:[#allocation2 + $0xb4] ss:$8 sps:$4 sm:$0xff]  }
  0x39   :  { %v1409_v63 = vld [vmem:[%s1851_s5 + $0xb0] ss:$8 sps:$4 sm:$0xff]   ;;  %v1417_v1 = vld [vmem:[%s1851_s5 + $0xc4] ss:$8 sps:$4 sm:$0xff]   ;;  %v1415_v3 = vld [vmem:[%s1851_s5 + $0xc0] ss:$8 sps:$4 sm:$0xff]  }
  0x3a   :  { %531 = vmatpush1.bf16.msra.mxu0 %v1349_v23  ;;  %v1412_v0 = vld [vmem:[#allocation2 + $0xb0] ss:$8 sps:$4 sm:$0xff]   ;;  %v1420_v2 = vld [vmem:[#allocation2 + $0xc4] ss:$8 sps:$4 sm:$0xff]   ;;  %v1418_v4 = vld [vmem:[#allocation2 + $0xc0] ss:$8 sps:$4 sm:$0xff]  }
  0x3b   :  { %778 = vmatpush1.bf16.msra.mxu1 %v1352_v24  ;;  %532 = vmatprep.subr.bf16.mxu0 %v1357_v25  ;;  %v1423_v5 = vld [vmem:[%s1851_s5 + $0xd4] ss:$8 sps:$4 sm:$0xff]   ;;  %v1421_v6 = vld [vmem:[%s1851_s5 + $0xd0] ss:$8 sps:$4 sm:$0xff]   ;;  %v1429_v9 = vld [vmem:[%s1851_s5 + $0xe4] ss:$8 sps:$4 sm:$0xff]  }
  0x3c   :  { %779 = vmatprep.subr.bf16.mxu1 %v1360_v26  ;;  %v1424_v7 = vld [vmem:[#allocation2 + $0xd0] ss:$8 sps:$4 sm:$0xff]   ;;  %v1426_v8 = vld [vmem:[#allocation2 + $0xd4] ss:$8 sps:$4 sm:$0xff]   ;;  %v1432_v10 = vld [vmem:[#allocation2 + $0xe4] ss:$8 sps:$4 sm:$0xff]  }
  0x3d   :  { %v1427_v11 = vld [vmem:[%s1851_s5 + $0xe0] ss:$8 sps:$4 sm:$0xff]   ;;  %v1435_v13 = vld [vmem:[%s1851_s5 + $0xf4] ss:$8 sps:$4 sm:$0xff]   ;;  %v1433_v15 = vld [vmem:[%s1851_s5 + $0xf0] ss:$8 sps:$4 sm:$0xff]  }
  0x3e   :  { %533 = vmatpush1.bf16.msra.mxu0 %v1355_v27  ;;  %v1430_v12 = vld [vmem:[#allocation2 + $0xe0] ss:$8 sps:$4 sm:$0xff]   ;;  %v1438_v14 = vld [vmem:[#allocation2 + $0xf4] ss:$8 sps:$4 sm:$0xff]   ;;  %v1436_v16 = vld [vmem:[#allocation2 + $0xf0] ss:$8 sps:$4 sm:$0xff]  }
  0x3f   :  { %780 = vmatpush1.bf16.msra.mxu1 %v1358_v28  ;;  %534 = vmatprep.subr.bf16.mxu0 %v1363_v29  ;;  %v1439_v17 = vld [vmem:[%s1855_s9 + $0x40] sm:$0xff]   ;;  %v293_v20 = vshrl.u32 %v292_v19, 7  ;;  %v1462_v19 = vld [vmem:[%s1855_s9 + $0xa8] sm:$0xff]  }
  0x40   :  { %781 = vmatprep.subr.bf16.mxu1 %v1366_v30  ;;  %v1440_v18 = vld [vmem:[%s1855_s9 + $0xc0] sm:$0xff]  }
  0x41   :  { %v1734_v29 = vsub.s32 0, %v293_v20  ;;  %v302_v30 = vsub.s32 2, %v293_v20 }
  0x42   :  { %535 = vmatpush1.bf16.msra.mxu0 %v1361_v31  ;;  %v290_v31 = vld [vmem:[%s1850_s4] sm:$0xf] }
  0x43   :  { %782 = vmatpush1.bf16.msra.mxu1 %v1364_v32  ;;  %536 = vmatprep.subr.bf16.mxu0 %v1369_v33  ;;  %v1739_v32 = vsub.s32 1, %v293_v20  ;;  %v306_v33 = vsub.s32 3, %v293_v20  ;;  %v1463_v20 = vld [vmem:[%s1855_s9 + $0x70] sm:$0xff]  }
  0x44   :  { %783 = vmatprep.subr.bf16.mxu1 %v1372_v34  ;;  %v295_v34 = vrot.slane %v290_v31, %v1734_v29 }
  0x46   :  { %537 = vmatpush1.bf16.msra.mxu0 %v1367_v35  ;;  %v303_v35 = vrot.slane %v290_v31, %v302_v30  ;;  %v603_v30 = vld [vmem:[%s1854_s8] sm:$0x3] }
  0x47   :  { %784 = vmatpush1.bf16.msra.mxu1 %v1370_v36  ;;  %538 = vmatprep.subr.bf16.mxu0 %v1375_v37 }
  0x48   :  { %785 = vmatprep.subr.bf16.mxu1 %v1378_v38  ;;  %v299_v38 = vrot.slane %v290_v31, %v1739_v32 }
  0x4a   :  { %539 = vmatpush1.bf16.msra.mxu0 %v1373_v39  ;;  %v307_v39 = vrot.slane %v290_v31, %v306_v33  ;;  %v608_v33 = vrot.slane %v603_v30, %v1734_v29 }
  0x4b   :  { %786 = vmatpush1.bf16.msra.mxu1 %v1376_v40  ;;  %540 = vmatprep.subr.bf16.mxu0 %v1381_v41 }
  0x4c   :  { %787 = vmatprep.subr.bf16.mxu1 %v1384_v42 }
  0x4e   :  { %541 = vmatpush1.bf16.msra.mxu0 %v1379_v43 }
  0x4f   :  { %788 = vmatpush1.bf16.msra.mxu1 %v1382_v44  ;;  %542 = vmatprep.subr.bf16.mxu0 %v1387_v45 }
  0x50   :  { %789 = vmatprep.subr.bf16.mxu1 %v1390_v46 }
  0x52   :  { %543 = vmatpush1.bf16.msra.mxu0 %v1385_v47 }
  0x53   :  { %790 = vmatpush1.bf16.msra.mxu1 %v1388_v48  ;;  %544 = vmatprep.subr.bf16.mxu0 %v1393_v49 }
  0x54   :  { %791 = vmatprep.subr.bf16.mxu1 %v1396_v50 }
  0x56   :  { %545 = vmatpush1.bf16.msra.mxu0 %v1391_v51 }
  0x57   :  { %792 = vmatpush1.bf16.msra.mxu1 %v1394_v52  ;;  %546 = vmatprep.subr.bf16.mxu0 %v1399_v53 }
  0x58   :  { %793 = vmatprep.subr.bf16.mxu1 %v1402_v54 }
  0x5a   :  { %547 = vmatpush1.bf16.msra.mxu0 %v1397_v55 }
  0x5b   :  { %794 = vmatpush1.bf16.msra.mxu1 %v1400_v56  ;;  %548 = vmatprep.subr.bf16.mxu0 %v1405_v57 }
  0x5c   :  { %795 = vmatprep.subr.bf16.mxu1 %v1408_v58 }
  0x5e   :  { %549 = vmatpush1.bf16.msra.mxu0 %v1403_v59 }
  0x5f   :  { %796 = vmatpush1.bf16.msra.mxu1 %v1406_v60  ;;  %550 = vmatprep.subr.bf16.mxu0 %v1411_v61  ;;  %v1441_v60 = vld [vmem:[%s1855_s9] sm:$0xff]  }
  0x60   :  { %797 = vmatprep.subr.bf16.mxu1 %v1414_v62  ;;  %v1442_v61 = vld [vmem:[%s1855_s9 + $0x80] sm:$0xff]  }
  0x62   :  { %551 = vmatpush1.bf16.msra.mxu0 %v1409_v63 }
  0x63   :  { %798 = vmatpush1.bf16.msra.mxu1 %v1412_v0  ;;  %552 = vmatprep.subr.bf16.mxu0 %v1417_v1  ;;  %v1443_v0 = vld [vmem:[%s1855_s9 + $0x48] sm:$0xff]  }
  0x64   :  { %799 = vmatprep.subr.bf16.mxu1 %v1420_v2  ;;  %v1444_v1 = vld [vmem:[%s1855_s9 + $0xc8] sm:$0xff]  }
  0x65   :  { %v1445_v2 = vld [vmem:[%s1855_s9 + $0x8] sm:$0xff]  }
  0x66   :  { %553 = vmatpush1.bf16.msra.mxu0 %v1415_v3  ;;  %v1446_v3 = vld [vmem:[%s1855_s9 + $0x88] sm:$0xff]  }
  0x67   :  { %800 = vmatpush1.bf16.msra.mxu1 %v1418_v4  ;;  %554 = vmatprep.subr.bf16.mxu0 %v1423_v5  ;;  %v1447_v4 = vld [vmem:[%s1855_s9 + $0x50] sm:$0xff]  }
  0x68   :  { %801 = vmatprep.subr.bf16.mxu1 %v1426_v8  ;;  %v1448_v5 = vld [vmem:[%s1855_s9 + $0xd0] sm:$0xff]   ;;  %v1451_v8 = vld [vmem:[%s1855_s9 + $0x58] sm:$0xff]  }
  0x6a   :  { %555 = vmatpush1.bf16.msra.mxu0 %v1421_v6  ;;  %v1449_v6 = vld [vmem:[%s1855_s9 + $0x10] sm:$0xff]  }
  0x6b   :  { %802 = vmatpush1.bf16.msra.mxu1 %v1424_v7  ;;  %556 = vmatprep.subr.bf16.mxu0 %v1429_v9  ;;  %v1450_v7 = vld [vmem:[%s1855_s9 + $0x90] sm:$0xff]   ;;  %v1452_v9 = vld [vmem:[%s1855_s9 + $0xd8] sm:$0xff]  }
  0x6c   :  { %803 = vmatprep.subr.bf16.mxu1 %v1432_v10  ;;  %v1453_v10 = vld [vmem:[%s1855_s9 + $0x18] sm:$0xff]  }
  0x6e   :  { %557 = vmatpush1.bf16.msra.mxu0 %v1427_v11  ;;  %v1454_v11 = vld [vmem:[%s1855_s9 + $0x98] sm:$0xff]  }
  0x6f   :  { %804 = vmatpush1.bf16.msra.mxu1 %v1430_v12  ;;  %558 = vmatprep.subr.bf16.mxu0 %v1435_v13  ;;  %v1455_v12 = vld [vmem:[%s1855_s9 + $0x60] sm:$0xff]  }
  0x70   :  { %805 = vmatprep.subr.bf16.mxu1 %v1438_v14  ;;  %v1456_v13 = vld [vmem:[%s1855_s9 + $0xe0] sm:$0xff]  }
  0x71   :  { %v1457_v14 = vld [vmem:[%s1855_s9 + $0x20] sm:$0xff]  }
  0x72   :  { %559 = vmatpush1.bf16.msra.mxu0 %v1433_v15  ;;  %v1458_v15 = vld [vmem:[%s1855_s9 + $0xa0] sm:$0xff]  }
  0x73   :  { %806 = vmatpush1.bf16.msra.mxu1 %v1436_v16  ;;  %1284 = vmatprep.subr.bf16.mxu0 %v1439_v17  ;;  %v1459_v16 = vld [vmem:[%s1855_s9 + $0x68] sm:$0xff]  }
  0x74   :  { %1306 = vmatprep.subr.bf16.mxu1 %v1440_v18  ;;  %v1460_v17 = vld [vmem:[%s1855_s9 + $0xe8] sm:$0xff]  }
  0x75   :  { %v1461_v18 = vld [vmem:[%s1855_s9 + $0x28] sm:$0xff]  }
 0x100   :  { %v136_v21 = vpop.f32.mrb[0].mxu0 }
 0x101   :  { %v177_v22 = vpop.f32.mrb[0].mxu1  ;;  %v138_v23 = vpop.f32.mrb[1].mxu0 }
 0x102   :  { %v179_v24 = vpop.f32.mrb[1].mxu1  ;;  %v140_v25 = vpop.f32.mrb[2].mxu0 }
 0x103   :  { %v181_v26 = vpop.f32.mrb[2].mxu1  ;;  %v141_v27 = vpop.f32.mrb[3].mxu0  ;;  %v1468_v25 = vld [vmem:[%s1855_s9 + $0xf8] sm:$0xff]  }
 0x104   :  { %v182_v28 = vpop.f32.mrb[3].mxu1  ;;  %v1469_v26 = vld [vmem:[%s1855_s9 + $0x38] sm:$0xff]  }
 0x105   :  { %v1470_v27 = vld [vmem:[%s1855_s9 + $0xb8] sm:$0xff]   ;;  %v356_v28 = vld [vmem:[%s1852_s6] sm:$0x3] }
 0x106   :  { %v361_v31 = vrot.slane %v356_v28, %v1734_v29 }
 0x108   :  { %v242_v36 = vpop.f32.mrb[4].mxu0 }
 0x109   :  { %v283_v37 = vpop.f32.mrb[4].mxu1  ;;  %v243_v40 = vadd.f32 %v242_v36, %v136_v21  ;;  %v244_v42 = vpop.f32.mrb[5].mxu0  ;;  %v1464_v21 = vld [vmem:[%s1855_s9 + $0xf0] sm:$0xff]  }
 0x10a   :  { %v284_v41 = vadd.f32 %v283_v37, %v177_v22  ;;  %v285_v43 = vpop.f32.mrb[5].mxu1  ;;  %v245_v44 = vadd.f32 %v244_v42, %v138_v23  ;;  %v246_v46 = vpop.f32.mrb[6].mxu0  ;;  %v1465_v22 = vld [vmem:[%s1855_s9 + $0x30] sm:$0xff]  }
 0x10b   :  { %v286_v45 = vadd.f32 %v285_v43, %v179_v24  ;;  %v287_v47 = vpop.f32.mrb[6].mxu1  ;;  %v312_v48 = vadd.f32 %v295_v34, %v243_v40  ;;  %v247_v50 = vpop.f32.mrb[7].mxu0  ;;  %v1466_v23 = vld [vmem:[%s1855_s9 + $0xb0] sm:$0xff]   ;;  %v1467_v24 = vld [vmem:[%s1855_s9 + $0x78] sm:$0xff]   ;;  %v365_v34 = vrot.slane %v356_v28, %v1739_v32 }
 0x10c   :  { %v314_v49 = vadd.f32 %v303_v35, %v284_v41  ;;  %v288_v51 = vpop.f32.mrb[7].mxu1  ;;  %v313_v52 = vadd.f32 %v299_v38, %v245_v44  ;;  %v612_v35 = vrot.slane %v603_v30, %v1739_v32 }
 0x10d   :  { %v315_v53 = vadd.f32 %v307_v39, %v286_v45  ;;  %v316_v54 = vmax.f32 %v312_v48, 0.0 }
 0x10e   :  { %v318_v55 = vmax.f32 %v314_v49, 0.0  ;;  %v317_v56 = vmax.f32 %v313_v52, 0.0 }
 0x10f   :  { %v319_v57 = vmax.f32 %v315_v53, 0.0  ;;  %v320_v62 = vpack.c.bf16 %v316_v54, %v316_v54 }
 0x110   :  { %v321_v58 = vpack.c.bf16 %v317_v56, %v317_v56  ;;  %v322_v63 = vpack.c.bf16 %v318_v55, %v318_v55  ;;  %v1251_v56 = vld [vmem:[#allocation4] ss:$0 sm:$0xff] }
 0x111   :  { %v323_v59 = vpack.c.bf16 %v319_v57, %v319_v57 }
 0x112   :  { %560 = vmatprep.mubr.bf16.mxu0 %v321_v58 }
 0x113   :  { %807 = vmatprep.mubr.bf16.mxu1 %v323_v59  ;;  %561 = vmatmul.mubr.bf16.vlgmr.msra.gmra.mrb[8].mxu0 %v320_v62 }
 0x114   :  { %808 = vmatmul.mubr.bf16.vlgmr.msra.gmra.mrb[8].mxu1 %v322_v63  ;;  %1285 = vmatpush3.bf16.msra.mxu0 %v1441_v60 }
 0x115   :  { %1307 = vmatpush3.bf16.msra.mxu1 %v1442_v61  ;;  %1286 = vmatprep.subr.bf16.mxu0 %v1443_v0 }
 0x116   :  { %1308 = vmatprep.subr.bf16.mxu1 %v1444_v1 }
 0x118   :  { %1287 = vmatpush3.bf16.msra.mxu0 %v1445_v2 }
 0x119   :  { %1309 = vmatpush3.bf16.msra.mxu1 %v1446_v3  ;;  %1288 = vmatprep.subr.bf16.mxu0 %v1447_v4 }
 0x11a   :  { %1310 = vmatprep.subr.bf16.mxu1 %v1448_v5 }
 0x11c   :  { %1289 = vmatpush3.bf16.msra.mxu0 %v1449_v6 }
 0x11d   :  { %1311 = vmatpush3.bf16.msra.mxu1 %v1450_v7  ;;  %1290 = vmatprep.subr.bf16.mxu0 %v1451_v8 }
 0x11e   :  { %1312 = vmatprep.subr.bf16.mxu1 %v1452_v9 }
 0x120   :  { %1291 = vmatpush3.bf16.msra.mxu0 %v1453_v10 }
 0x121   :  { %1313 = vmatpush3.bf16.msra.mxu1 %v1454_v11  ;;  %1292 = vmatprep.subr.bf16.mxu0 %v1455_v12 }
 0x122   :  { %1314 = vmatprep.subr.bf16.mxu1 %v1456_v13 }
 0x124   :  { %1293 = vmatpush3.bf16.msra.mxu0 %v1457_v14 }
 0x125   :  { %1315 = vmatpush3.bf16.msra.mxu1 %v1458_v15  ;;  %1294 = vmatprep.subr.bf16.mxu0 %v1459_v16 }
 0x126   :  { %1316 = vmatprep.subr.bf16.mxu1 %v1460_v17 }
 0x128   :  { %1295 = vmatpush3.bf16.msra.mxu0 %v1461_v18 }
 0x129   :  { %1317 = vmatpush3.bf16.msra.mxu1 %v1462_v19  ;;  %1296 = vmatprep.subr.bf16.mxu0 %v1463_v20 }
 0x12a   :  { %1318 = vmatprep.subr.bf16.mxu1 %v1464_v21 }
 0x12c   :  { %1297 = vmatpush3.bf16.msra.mxu0 %v1465_v22 }
 0x12d   :  { %1319 = vmatpush3.bf16.msra.mxu1 %v1466_v23  ;;  %1298 = vmatprep.subr.bf16.mxu0 %v1467_v24 }
 0x12e   :  { %1320 = vmatprep.subr.bf16.mxu1 %v1468_v25 }
 0x130   :  { %1299 = vmatpush3.bf16.msra.mxu0 %v1469_v26 }
 0x131   :  { %1321 = vmatpush3.bf16.msra.mxu1 %v1470_v27 }
 0x1e6   :  { %v562_v36 = vpop.f32.mrb[8].mxu0 }
 0x1e7   :  { %v809_v37 = vpop.f32.mrb[8].mxu1  ;;  %v563_v38 = vadd.f32 %v562_v36, %v361_v31  ;;  %v564_v40 = vpop.f32.mrb[9].mxu0 }
 0x1e8   :  { %v810_v39 = vadd.f32 %v809_v37, %v608_v33  ;;  %v811_v41 = vpop.f32.mrb[9].mxu1  ;;  %v565_v42 = vadd.f32 %v564_v40, %v365_v34  ;;  %v566_v44 = vpop.f32.mrb[10].mxu0 }
 0x1e9   :  { %v812_v43 = vadd.f32 %v811_v41, %v612_v35  ;;  %v813_v45 = vpop.f32.mrb[10].mxu1  ;;  %v569_v46 = vmax.f32 %v563_v38, 0.0  ;;  %v567_v48 = vpop.f32.mrb[11].mxu0 }
 0x1ea   :  { %v816_v47 = vmax.f32 %v810_v39, 0.0  ;;  %v814_v49 = vpop.f32.mrb[11].mxu1  ;;  %v570_v50 = vmax.f32 %v565_v42, 0.0 }
 0x1eb   :  { %v817_v29 = vmax.f32 %v812_v43, 0.0  ;;  %v818_v53 = vpack.c.bf16 %v569_v46, %v569_v46 }
 0x1ec   :  { %v819_v51 = vpack.c.bf16 %v570_v50, %v570_v50  ;;  %v820_v32 = vpack.c.bf16 %v816_v47, %v816_v47 }
 0x1ed   :  { %v821_v52 = vpack.c.bf16 %v817_v29, %v817_v29 }
 0x1ee   :  { %1117 = vmatprep.mubr.bf16.mxu0 %v819_v51 }
 0x1ef   :  { %1157 = vmatprep.mubr.bf16.mxu1 %v821_v52  ;;  %1118 = vmatmul.mubr.bf16.vlgmr.msra.gmra.mrb[12].mxu0 %v818_v53 }
 0x1f0   :  { %1158 = vmatmul.mubr.bf16.vlgmr.msra.gmra.mrb[12].mxu1 %v820_v32 }
 0x2c2   :  { %v1300_v54 = vpop.f32.mrb[12].mxu0 }
 0x2c3   :  { %v1322_v55 = vpop.f32.mrb[12].mxu1  ;;  %v1301_v57 = vpop.f32.mrb[13].mxu0 }
 0x2c4   :  { %v1323_v58 = vpop.f32.mrb[13].mxu1  ;;  %v1302_v59 = vadd.f32 %v1301_v57, %v1300_v54  ;;  %v1303_v61 = vpop.f32.mrb[14].mxu0 }
 0x2c5   :  { %v1324_v60 = vadd.f32 %v1323_v58, %v1322_v55  ;;  %v1325_v62 = vpop.f32.mrb[14].mxu1  ;;  %v1304_v63 = vpop.f32.mrb[15].mxu0 }
 0x2c6   :  { %v1326_v0 = vpop.f32.mrb[15].mxu1  ;;  %v1120_v1 = vadd.f32 %v1302_v59, %v1251_v56 }
 0x2c8   :  { %v1160_v2 = vadd.f32 %v1324_v60, %v1120_v1 }
 0x2ca   :  { %1166 = vst.msk [vmem:[%s1857_s11] sm:$0xff] %vm1165_vm3, %v1160_v2 }
 0x2cb   :  { %1171 = vsyncpa [#allocation3], 1 }
 0x2cc   :  { %1172 = vsyncpa [#allocation5], 1 }

</bundles_post_ra>
